<compile_context>
chip_gen: v7x
topology: tpu7x:2x2x1
jax: 0.10.0
libtpu: 0.0.40
codegen_flags: <defaults>
</compile_context>

<pallas_src>
import jax
import jax.numpy as jnp
from jax.experimental import pallas as pl
from jax.experimental.pallas import tpu as pltpu

IGNORE_INDEX = 250


def _round_up(x, m):
    return (x + m - 1) // m * m


def _pick_tile(p, cap=8192):
    """Largest multiple-of-128 divisor of p (p % 128 == 0), capped at `cap`."""
    t = min(p, cap)
    t -= t % 128
    while t > 128 and p % t != 0:
        t -= 128
    return max(t, 128)


# ---------------------------------------------------------------------------
# Kernel 1: sim_depth_loss, fused over scales.  grid = (S,)
#   Whole flattened (rows, 128) depth slab per scale lives in VMEM (depth maps
#   are small); the global max needed for `c` is a single in-kernel reduce.
# ---------------------------------------------------------------------------
def _sim_depth_kernel(yt_ref, yp_ref, out_ref):
    y_true = yt_ref[...].astype(jnp.float32)            # (rows, 128)
    y_pred = yp_ref[...].astype(jnp.float32)            # (rows, 128)

    # mask * y_pred (where-form; identical for finite inputs, avoids 0*NaN)
    y_pred = jnp.where(y_true > 0.0, y_pred, 0.0)

    diff = y_pred - y_true
    abs_d = jnp.abs(diff)
    c = 0.2 * jnp.max(abs_d)                             # scalar, whole slab
    inv = 1.0 / (2.0 * c)                                # hoisted scalar recip
    loss = jnp.where(abs_d <= c, abs_d, (diff * diff + c * c) * inv)

    # 128-lane partial sums; padded elements contribute exactly 0.
    out_ref[...] = jnp.sum(loss, axis=0, keepdims=True)  # (1, 128)


def fused_sim_depth_loss(y_true, y_pred_list):
    """Returns per-scale sim_depth_loss, shape (S,)."""
    s = len(y_pred_list)
    total = y_true.size
    total_pad = _round_up(total, 128)
    rows = total_pad // 128

    yt = y_true.reshape(-1)
    yp = jnp.stack([p.reshape(-1) for p in y_pred_list], axis=0)   # (S, total)
    if total_pad != total:
        pad = total_pad - total
        yt = jnp.pad(yt, (0, pad))                       # y_true<=0 -> masked
        yp = jnp.pad(yp, ((0, 0), (0, pad)))
    yt = yt.reshape(rows, 128)                           # lane-dense slab
    yp = yp.reshape(s, rows, 128)

    out = pl.pallas_call(
        _sim_depth_kernel,
        out_shape=jax.ShapeDtypeStruct((s, 1, 128), jnp.float32),
        grid_spec=pltpu.PrefetchScalarGridSpec(
            num_scalar_prefetch=0,
            grid=(s,),
            in_specs=[
                pl.BlockSpec((rows, 128), lambda si: (0, 0)),          # shared gt
                pl.BlockSpec((None, rows, 128), lambda si: (si, 0, 0)),
            ],
            out_specs=pl.BlockSpec((None, 1, 128), lambda si: (si, 0, 0)),
        ),
        compiler_params=pltpu.CompilerParams(
            dimension_semantics=("parallel",),
            vmem_limit_bytes=32 * 1024 * 1024,
        ),
    )(yt, yp)

    return jnp.sum(out.reshape(s, -1), axis=-1) / jnp.float32(total)   # (S,)


# ---------------------------------------------------------------------------
# Kernel 2: cross_entropy2d (ignore_index=250, mean), fused over scales.
#   grid = (S, N, P//TILE_P).  logits block (C, TILE_P): class axis on
#   sublanes, pixels lane-dense.  Per-scale accumulator block (2, TILE_P):
#   row 0 = sum of per-pixel losses, row 1 = valid-pixel count.
# ---------------------------------------------------------------------------
def _ce_kernel(logits_ref, labels_ref, out_ref):
    ni = pl.program_id(1)
    ti = pl.program_id(2)

    @pl.when(jnp.logical_and(ni == 0, ti == 0))
    def _init():
        out_ref[...] = jnp.zeros_like(out_ref)

    logits = logits_ref[...].astype(jnp.float32)         # (C, TILE_P)
    tgt = labels_ref[...]                                 # (1, TILE_P) int32

    # class-axis (sublane) reductions; pixels stay lane-dense.
    m = jnp.max(logits, axis=0, keepdims=True)                           # (1,T)
    lse = m + jnp.log(jnp.sum(jnp.exp(logits - m), axis=0, keepdims=True))

    class_ids = jax.lax.broadcasted_iota(jnp.int32, logits.shape, 0)     # (C,T)
    tgt_logit = jnp.sum(jnp.where(class_ids == tgt, logits, 0.0),
                        axis=0, keepdims=True)                           # (1,T)

    valid = (tgt != IGNORE_INDEX).astype(jnp.float32)                    # (1,T)
    per_pixel = (lse - tgt_logit) * valid                                # (1,T)

    out_ref[...] += jnp.concatenate([per_pixel, valid], axis=0)          # (2,T)


def fused_cross_entropy2d(logits_list, labels_nhw):
    """Returns per-scale mean cross-entropy (ignore_index=250), shape (S,)."""
    s = len(logits_list)
    n, c, h, w = logits_list[0].shape
    nt, ht, wt = labels_nhw.shape
    # TODO(synk): bilinear-resize path (h != ht and w != wt) of the reference
    # is not implemented; shapes are kept equal in this setting.
    assert h == ht and w == wt

    p = h * w
    p_pad = _round_up(p, 128)

    # Keep NCHW: free reshape to (S, N, C, P); no transpose, producer dtype kept.
    logits = jnp.stack([x.reshape(n, c, p) for x in logits_list], axis=0)
    labels = labels_nhw.reshape(n, p).astype(jnp.int32)          # lane-dense

    if p_pad != p:
        logits = jnp.pad(logits, ((0, 0), (0, 0), (0, 0), (0, p_pad - p)))
        labels = jnp.pad(labels, ((0, 0), (0, p_pad - p)),
                         constant_values=IGNORE_INDEX)           # contributes 0

    tile_p = _pick_tile(p_pad)
    grid = (s, n, p_pad // tile_p)

    sums = pl.pallas_call(
        _ce_kernel,
        out_shape=jax.ShapeDtypeStruct((s, 2, tile_p), jnp.float32),
        grid_spec=pltpu.PrefetchScalarGridSpec(
            num_scalar_prefetch=0,
            grid=grid,
            in_specs=[
                pl.BlockSpec((None, None, c, tile_p),
                             lambda si, ni, ti: (si, ni, 0, ti)),
                pl.BlockSpec((1, tile_p), lambda si, ni, ti: (ni, ti)),
            ],
            out_specs=pl.BlockSpec((None, 2, tile_p),
                                   lambda si, ni, ti: (si, 0, 0)),
        ),
        compiler_params=pltpu.CompilerParams(
            dimension_semantics=("parallel", "arbitrary", "arbitrary"),
            vmem_limit_bytes=32 * 1024 * 1024,
        ),
    )(logits, labels)

    loss_sum = jnp.sum(sums[:, 0, :], axis=-1)    # (S,)
    valid_sum = jnp.sum(sums[:, 1, :], axis=-1)   # (S,)
    return loss_sum / valid_sum                   # (S,)  (NaN if all ignored, as in torch)


# ---------------------------------------------------------------------------
# Loss module (JAX / Pallas port)
# ---------------------------------------------------------------------------
class Loss:
    def __init__(self, loss_weights=0.8, delta1=0.1, delta2=10.0):
        self.loss_weights = jnp.array(
            [loss_weights ** (3 - i) for i in range(4)], dtype=jnp.float32)
        # nn.Parameter(torch.Tensor([delta])) -> shape (1,) float32 params.
        self.delta1 = jnp.array([delta1], dtype=jnp.float32)
        self.delta2 = jnp.array([delta2], dtype=jnp.float32)

    def __call__(self, outputs, depths, labels):
        depth_preds = [pair[0] for pair in outputs]
        seg_logits = [pair[1] for pair in outputs]

        dl = fused_sim_depth_loss(depths, depth_preds)    # (S,)
        ce = fused_cross_entropy2d(seg_logits, labels)    # (S,)

        w = self.loss_weights[: len(outputs)]
        per_scale = self.delta1[0] * w * dl + self.delta2[0] * w * ce
        return jnp.sum(per_scale).reshape(1)              # shape (1,) like torch


# ---------------------------------------------------------------------------
# Example run
# ---------------------------------------------------------------------------
if __name__ == "__main__":
    key = jax.random.PRNGKey(0)
    N, C, H, W = 2, 8, 16, 16
    NUM_SCALES = 4

    k_depth, k_lab, k_ign, *k_out = jax.random.split(key, 3 + 2 * NUM_SCALES)

    # Ground-truth depth (some non-positive entries to exercise the mask).
    depths = jax.random.uniform(k_depth, (N, 1, H, W), jnp.float32,
                                minval=-0.2, maxval=5.0)

    # Segmentation labels in [0, C), with a few ignore_index=250 pixels.
    labels = jax.random.randint(k_lab, (N, H, W), 0, C, dtype=jnp.int32)
    ignore_mask = jax.random.uniform(k_ign, (N, H, W)) < 0.05
    labels = jnp.where(ignore_mask, jnp.int32(IGNORE_INDEX), labels)

    # Four (depth_pred, seg_logits) output pairs.
    outputs = []
    for i in range(NUM_SCALES):
        dpred = jax.random.uniform(k_out[2 * i], (N, 1, H, W), jnp.float32,
                                   minval=0.0, maxval=5.0)
        slog = jax.random.normal(k_out[2 * i + 1], (N, C, H, W), jnp.float32)
        outputs.append((dpred, slog))

    loss_mod = Loss()
    loss = loss_mod(outputs, depths, labels)
    loss = jax.block_until_ready(loss)

    assert loss.shape == (1,) and jnp.isfinite(loss).all()
    print("KERNEL_OK")
</pallas_src>

<mosaic_0001>
module attributes {stable_mosaic.version = 11 : i64} {
  func.func @_sim_depth_kernel(%arg0: i32, %arg1: memref<4x128xf32, #tpu.memory_space<vmem>>, %arg2: memref<1x4x128xf32, #tpu.memory_space<vmem>>, %arg3: memref<1x1x128xf32, #tpu.memory_space<vmem>>) attributes {dimension_semantics = [#tpu.dimension_semantics<parallel>], iteration_bounds = array<i64: 4>, scalar_prefetch = 0 : i64, scratch_operands = 0 : i64, tpu.core_type = #tpu.core_type<tc>, window_params = [{pipeline_mode = #tpu.pipeline_mode<synchronous>, transform_indices = @transform_0, window_bounds = array<i64: 4, 128>}, {transform_indices = @transform_1, window_bounds = array<i64: 1, 4, 128>}, {transform_indices = @transform_2, window_bounds = array<i64: 1, 1, 128>}]} {
    %c0 = arith.constant 0 : index
    %c0_0 = arith.constant 0 : index
    %0 = vector.load %arg1[%c0, %c0_0] : memref<4x128xf32, #tpu.memory_space<vmem>>, vector<4x128xf32>
    %c0_1 = arith.constant 0 : index
    %c0_2 = arith.constant 0 : index
    %c0_3 = arith.constant 0 : index
    %1 = vector.load %arg2[%c0_1, %c0_2, %c0_3] : memref<1x4x128xf32, #tpu.memory_space<vmem>>, vector<1x4x128xf32>
    %2 = vector.shape_cast %1 : vector<1x4x128xf32> to vector<4x128xf32>
    %cst = arith.constant 0.000000e+00 : f32
    %3 = vector.broadcast %cst : f32 to vector<4x128xf32>
    %4 = arith.cmpf ogt, %0, %3 : vector<4x128xf32>
    %cst_4 = arith.constant 0.000000e+00 : f32
    %5 = vector.broadcast %cst_4 : f32 to vector<4x128xf32>
    %6 = arith.select %4, %2, %5 : vector<4x128xi1>, vector<4x128xf32>
    %7 = arith.subf %6, %0 : vector<4x128xf32>
    %8 = math.absf %7 : vector<4x128xf32>
    %9 = vector.shape_cast %8 : vector<4x128xf32> to vector<1x4x128xf32>
    %cst_5 = arith.constant dense<0xFF800000> : vector<1xf32>
    %10 = vector.multi_reduction <maximumf>, %9, %cst_5 [1, 2] : vector<1x4x128xf32> to vector<1xf32>
    %11 = vector.shape_cast %10 : vector<1xf32> to vector<1x1x1xf32>
    %12 = vector.extract %11[0, 0, 0] : f32 from vector<1x1x1xf32>
    %cst_6 = arith.constant 2.000000e-01 : f32
    %13 = arith.mulf %cst_6, %12 : f32
    %cst_7 = arith.constant 2.000000e+00 : f32
    %14 = arith.mulf %cst_7, %13 : f32
    %cst_8 = arith.constant 1.000000e+00 : f32
    %15 = arith.divf %cst_8, %14 : f32
    %16 = vector.broadcast %13 : f32 to vector<4x128xf32>
    %17 = arith.cmpf ole, %8, %16 : vector<4x128xf32>
    %18 = arith.mulf %7, %7 : vector<4x128xf32>
    %19 = arith.mulf %13, %13 : f32
    %20 = vector.broadcast %19 : f32 to vector<4x128xf32>
    %21 = arith.addf %18, %20 : vector<4x128xf32>
    %22 = vector.broadcast %15 : f32 to vector<4x128xf32>
    %23 = arith.mulf %21, %22 : vector<4x128xf32>
    %24 = arith.select %17, %8, %23 : vector<4x128xi1>, vector<4x128xf32>
    %cst_9 = arith.constant dense<0.000000e+00> : vector<128xf32>
    %25 = vector.multi_reduction <add>, %24, %cst_9 [0] : vector<4x128xf32> to vector<128xf32>
    %26 = vector.shape_cast %25 : vector<128xf32> to vector<1x128xf32>
    %c0_10 = arith.constant 0 : index
    %c0_11 = arith.constant 0 : index
    %c0_12 = arith.constant 0 : index
    %27 = vector.load %arg3[%c0_10, %c0_11, %c0_12] : memref<1x1x128xf32, #tpu.memory_space<vmem>>, vector<1x1x128xf32>
    %28 = vector.shape_cast %27 : vector<1x1x128xf32> to vector<1x128xf32>
    %29 = vector.shape_cast %26 : vector<1x128xf32> to vector<1x1x128xf32>
    tpu.vector_store %arg3[%c0_10, %c0_11, %c0_12], %29 {strides = array<i32>} : memref<1x1x128xf32, #tpu.memory_space<vmem>>, vector<1x1x128xf32>,
    return
  }
  func.func @transform_0(%arg0: i32) -> (i32, i32) {
    %c0_i32 = arith.constant 0 : i32
    %c0_i32_0 = arith.constant 0 : i32
    %c0_i32_1 = arith.constant 0 : i32
    return %c0_i32, %c0_i32_0 : i32, i32
  }
  func.func @transform_1(%arg0: i32) -> (i32, i32, i32) {
    %c0_i32 = arith.constant 0 : i32
    %c0_i32_0 = arith.constant 0 : i32
    %c0_i32_1 = arith.constant 0 : i32
    return %arg0, %c0_i32, %c0_i32_0 : i32, i32, i32
  }
  func.func @transform_2(%arg0: i32) -> (i32, i32, i32) {
    %c0_i32 = arith.constant 0 : i32
    %c0_i32_0 = arith.constant 0 : i32
    %c0_i32_1 = arith.constant 0 : i32
    return %arg0, %c0_i32, %c0_i32_0 : i32, i32, i32
  }
}

</mosaic_0001>

<bundles_post_ra>
// kernel: tpu_custom_call.1
= control target key start
LH: loop header
LB: loop body
LE: loop exit
PB: predicated region body
PF: predicated region fallthrough
CT: control target
= control target key end

     0   :  { %7 = vsyncpa [#allocation3], 0  ;;  %s726_s0 = inlined_call_operand.hbm [shape: f32[4,128], index: 0, kind: input, shape index: {}]   ;;  %s727_s1 = inlined_call_operand.hbm [shape: f32[4,4,128], index: 1, kind: input, shape index: {}]   ;;  %s728_s2 = inlined_call_operand.hbm [shape: f32[4,1,128], index: 2, kind: output, shape index: {}]  }
   0x1   :  { %8 = vsyncpa [#allocation6], 0 }
   0x2   :  { %10 = vsyncpa [#allocation6 + $0x1], 0 }
   0x3   :  { %11 = vsyncpa [#allocation4], 0 }
   0x4   :  { %13 = vsyncpa [#allocation4 + $0x1], 0  ;;  %s524_s9 = smov 0   ;;  %s526_s10 = smov 0  }
   0x5   :  { %s528_s11 = smov 0   ;;  %s530_s12 = smov 0  }
   0x6 LB: > { %s545_s13 = sadd.s32 4294967295, %s504_s12   ;;  %s301_s14 = sadd.s32 4294967294, %s504_s12   ;;  %s504_s12 = sphi %s530_s12, %s751_s12   ;;  %s500_s11 = sphi %s528_s11, %s750_s11   ;;  %s496_s10 = sphi %s526_s10, %s749_s10   ;;  %s492_s9 = sphi %s524_s9, %s748_s9  }
   0x7   : > { %p60_p0 = scmp.ne.s32.totalorder %s496_s10, %s492_s9  ;;  %p729_p1 = scmp.eq.s32.totalorder %s545_s13, 0 }
   0x8   : > { %p90_p3 = scmp.eq.s32.totalorder %s301_s14, 3  ;;  %p302_p5 = scmp.ge.s32.totalorder %s504_s12, 1 }
   0x9   : > { %p554_p4 = por %p729_p1, %p60_p0  ;;  %p97_p7 = scmp.lt.s32.totalorder %s504_s12, 5 }
   0xa   : > { %p559_p6 = por %p90_p3, %p60_p0  ;;  %s506_s18 = smov [#allocation2]  }
   0xb   : > { %s732_s15 = scalar_select %p554_p4, 1, 0 }
   0xc   : > { %s733_s16 = scalar_select %p559_p6, 1, 0 }
   0xd   : > { %p564_p8 = pnand %p302_p5, %p97_p7  ;;  %s110_s19 = sshll.u32 %s506_s18, 4  ;;  %s111_s19 = int_to_ptr.vmem [resolvable:$true] %s110_s19 }
   0xe   : > { %s571_s20 = sadd.s32 1, %s504_s12   ;;  %s47_s24 = sadd.s32 1, %s500_s11 }
   0xf   : > { %s734_s17 = scalar_select %p564_p8, 1, 0 }
  0x10   : > { %p325_p9 = pneg %p564_p8  ;;  %s44_s22 = ssub.s32 %s504_s12, %s571_s20 }
  0x11   : > { %p581_p11 = scmp.eq.s32.totalorder %s44_s22, 0  ;;  %s376_s27 = scalar_lea.hbm %s726_s0, 64 }
  0x12   : > { %p575_p10 = pnand %p325_p9, %p729_p1  ;;  %p377_p13 = scmp.ne.s32.totalorder %s726_s0, %s376_s27 }
  0x13   : > { %s736_s23 = scalar_select %p581_p11, 1, 0 }
  0x14   : > { %p378_p0 = pneg %p575_p10  ;;  %p383_p7 = scmp.lt.u32.totalorder %s376_s27, %s726_s0 }
  0x16   : > { %p379_p3 = pnand %p378_p0, %p377_p13 }
  0x18   : > { %p380_p5 = pneg %p379_p3 }
  0x1a   : > { %p385_p9 = pnand %p383_p7, %p380_p5 }
  0x1c   : > { %388 = shalt.err (!%p385_p9)
}
  0x1d   : > { %s389_s4 = scalar_lea.vmem %s111_s19, 64  ;;  %p397_p6 = scmp.lt.s32.totalorder %s111_s19, %s111_s19 }
  0x1e   : > { %p390_p1 = scmp.ne.s32.totalorder %s111_s19, %s389_s4  ;;  %p398_p4 = scmp.lt.s32.totalorder %s389_s4, %s389_s4 }
  0x20   : > { %p392_p2 = pnand %p390_p1, %p378_p0  ;;  %p399_p8 = por %p398_p4, %p397_p6 }
  0x22   : > { %p393_p12 = pneg %p392_p2 }
  0x24   : > { %p400_p11 = pnand %p399_p8, %p393_p12 }
  0x26   : > { %403 = shalt.err (!%p400_p11)
}
  0x27   : > { %328 = dma.hbm_to_vmem [thread:$0]  (!%p575_p10), %s726_s0, 64, %s111_s19, [#allocation3]  }
  0x28   : > { %p737_p1 = scmp.ne.s32.totalorder %s736_s23, 0  ;;  %p55_p2 = scmp.eq.s32.totalorder %s504_s12, 0 }
  0x29   : > { %p738_p4 = scmp.ne.s32.totalorder %s500_s11, %s496_s10  ;;  %p739_p6 = scmp.eq.s32.totalorder %s545_s13, 3 }
  0x2a   : > { %s607_s7 = scalar_select %p737_p1, %s500_s11, %s47_s24  }
  0x2b   : > { %p615_p8 = por %p739_p6, %p738_p4  ;;  %p338_p11 = scmp.lt.s32.totalorder %s504_s12, 4 }
  0x2c   : > { %s121_s14 = sand.u32 1, %s500_s11   ;;  %p741_p12 = pmov %p738_p4 }
  0x2d   : > { %s305_s18 = sshll.u32 %s121_s14, 2  ;;  %s306_s21 = sshll.u32 %s504_s12, 6 }
  0x2e   : > { %p56_p13 = por %p55_p2, %p741_p12  ;;  %s628_s19 = scalar_lea.hbm %s727_s1, %s306_s21 }
  0x2f   : > { %s125_s23 = scalar_lea.vmem [#allocation5], %s305_s18  ;;  %s122_s27 = scalar_lea.sflag [#allocation6], %s121_s14 }
  0x30   : > { %s132_s24 = sshll.u32 %s125_s23, 4  ;;  %p630_p10 = pnand %p338_p11, %p56_p13  ;;  %s634_s24 = int_to_ptr.vmem [resolvable:$true] %s132_s24 }
  0x31   : > { %s404_s28 = scalar_lea.hbm %s628_s19, 64  ;;  %s409_s3 = scalar_lea.hbm %s727_s1, 256 }
  0x32   : > { %p405_p0 = scmp.ne.s32.totalorder %s628_s19, %s404_s28  ;;  %p406_p3 = pneg %p630_p10 }
  0x33   : > { %p410_p9 = scmp.lt.u32.totalorder %s628_s19, %s727_s1  ;;  %p411_p1 = scmp.lt.u32.totalorder %s409_s3, %s404_s28 }
  0x34   : > { %p407_p5 = pnand %p406_p3, %p405_p0  ;;  %p413_p4 = scmp.lt.u32.totalorder %s404_s28, %s628_s19 }
  0x35   : > { %p412_p2 = por %p411_p1, %p410_p9 }
  0x36   : > { %p408_p7 = pneg %p407_p5 }
  0x37   : > { %p414_p6 = por %p413_p4, %p412_p2 }
  0x39   : > { %p415_p11 = pnand %p414_p6, %p408_p7 }
  0x3b   : > { %418 = shalt.err (!%p415_p11)
}
  0x3c   : > { %s419_s6 = scalar_lea.vmem %s634_s24, 64  ;;  %s507_s14 = smov [#allocation5]  }
  0x3d   : > { %p420_p12 = scmp.ne.s32.totalorder %s634_s24, %s419_s6  ;;  %s424_s18 = sshll.u32 %s507_s14, 4  ;;  %s425_s18 = int_to_ptr.vmem [resolvable:$false] %s424_s18 }
  0x3e   : > { %s426_s21 = scalar_lea.vmem %s425_s18, 128  ;;  %p427_p5 = scmp.lt.s32.totalorder %s634_s24, %s425_s18 }
  0x3f   : > { %p422_p13 = pnand %p420_p12, %p406_p3  ;;  %p428_p9 = scmp.lt.s32.totalorder %s426_s21, %s419_s6 }
  0x41   : > { %p423_p0 = pneg %p422_p13  ;;  %p429_p1 = por %p428_p9, %p427_p5 }
  0x43   : > { %p430_p2 = pnand %p429_p1, %p423_p0 }
  0x45   : > { %433 = shalt.err (!%p430_p2)
}
  0x46   : > { %332 = dma.hbm_to_vmem [thread:$0]  (!%p630_p10), %s628_s19, 64, %s634_s24, %s122_s27  }
  0x47   : > { %p743_p7 = scmp.ne.s32.totalorder %s734_s17, 0 }
  0x48   : > { %p744_p3 = scmp.eq.s32.totalorder (!%p743_p7), %s545_s13, 0 }
  0x49   : > { %141 = sbr.rel (%p743_p7) target bundleno = 394 (0x18a), region = 28 }
  0x50   : > { %479 = dma.done.wait (%p744_p3), [#allocation3], 64   ;;  %p745_p4 = pmov %p744_p3 }
  0x51   : > { %s668_s22 = sand.u32 1, %s496_s10   ;;  %p746_p6 = scmp.ne.s32.totalorder %s732_s15, 0 }
  0x52   : > { %481 = vsyncadd (%p745_p4), [#allocation3], 4294967232  ;;  %s309_s25 = sshll.u32 %s668_s22, 2  ;;  %s148_s23 = scalar_lea.sflag [#allocation6], %s668_s22 }
  0x53   : > { %s151_s26 = scalar_lea.vmem [#allocation5], %s309_s25 }
  0x54   : > { %483 = dma.done.wait (%p746_p6), %s148_s23, 64  }
  0x55   : > { %485 = vsyncadd (%p746_p6), %s148_s23, 4294967232  ;;  %v171_v0 = vld [vmem:[#allocation2] sm:$0xf]  ;;  %v172_v1 = vld [vmem:[%s151_s26] sm:$0xf]  ;;  %vm177_vm1 = vcmask 1043456  }
  0x56   : > { %vm173_vm0 = vcmp.gt.f32.partialorder %v171_v0, 0.0  ;;  %s310_s28 = sshll.u32 %s545_s13, 4  ;;  %s170_s29 = scalar_lea.vmem [#allocation7], %s668_s22 }
  0x57   : > { %v174_v2 = vsel %vm173_vm0, %v172_v1, 0.0  ;;  %s223_s30 = sshll.u32 %s170_s29, 4  ;;  %s683_s5 = scalar_lea.hbm %s728_s2, %s310_s28  ;;  %s685_s30 = int_to_ptr.vmem [resolvable:$true] %s223_s30 }
  0x58   : > { %v175_v3 = vsub.f32 %v174_v2, %v171_v0  ;;  %s211_s6 = scalar_lea.sflag [#allocation4], %s668_s22  ;;  %s434_s14 = scalar_lea.vmem %s685_s30, 16 }
  0x59   : > { %p435_p10 = scmp.ne.s32.totalorder %s685_s30, %s434_s14  ;;  %s508_s13 = smov [#allocation7]  }
  0x5a   : > { %v176_v4 = vand.u32 2147483647, %v175_v3  ;;  %v195_v15 = vmul.f32 %v175_v3, %v175_v3  ;;  %s438_s18 = sshll.u32 %s508_s13, 4  ;;  %s439_s18 = int_to_ptr.vmem [resolvable:$false] %s438_s18 }
  0x5b   : > { %p436_p11 = pnand %p435_p10, %p615_p8  ;;  %s440_s21 = scalar_lea.vmem %s439_s18, 32 }
  0x5c   : > { %v178_v5 = vsel %vm177_vm1, %v176_v4, -inf  ;;  %p441_p13 = scmp.lt.s32.totalorder %s685_s30, %s439_s18  ;;  %p442_p0 = scmp.lt.s32.totalorder %s440_s21, %s434_s14 }
  0x5d   : > { %179 = vmax.xlane.f32.xlu0 %v178_v5  ;;  %p437_p12 = pneg %p436_p11 }
  0x5e   : > { %p443_p5 = por %p442_p0, %p441_p13 }
  0x60   : > { %p444_p9 = pnand %p443_p5, %p437_p12 }
  0xea   : > { %v180_v6 = vpop.xlane.xlu0 %179 }
  0xeb   : > { %v181_v7 = vrot.slane %v180_v6, 4 }
  0xed   : > { %v182_v8 = vmax.f32 %v180_v6, %v181_v7 }
  0xef   : > { %v183_v9 = vrot.slane %v182_v8, 2 }
  0xf1   : > { %v184_v10 = vmax.f32 %v182_v8, %v183_v9 }
  0xf3   : > { %v185_v11 = vrot.slane %v184_v10, 1 }
  0xf5   : > { %v186_v12 = vmax.f32 %v184_v10, %v185_v11 }
  0xf7   : > { %313 = vpush %v186_v12 }
 0x128   : > { %s314_s15 = spop %313 }
 0x129   : > { %s188_s17 = smul.f32 0.2, %s314_s15 }
 0x12b   : > { %s189_s19 = smul.f32 2.0, %s188_s17  ;;  %v193_v17 = vstv %s188_s17 }
 0x12c   : > { %s196_s24 = smul.f32 %s188_s17, %s188_s17  ;;  %vm194_vm2 = vcmp.le.f32.partialorder %v176_v4, %v193_v17 }
 0x12d   : > { %v190_v13 = vstv %s189_s19 }
 0x12e   : > { %374 = vrcp.f32 %v190_v13  ;;  %v197_v16 = vstv %s196_s24 }
 0x12f   : > { %v198_v18 = vadd.f32 %v197_v16, %v195_v15 }
 0x138   : > { %v375_v14 = vpop.eup %374 }
 0x139   : > { %315 = vpush %v375_v14 }
 0x16a   : > { %s316_s27 = spop %315 }
 0x16b   : > { %v199_v19 = vstv %s316_s27 }
 0x16c   : > { %v200_v20 = vmul.f32 %v199_v19, %v198_v18 }
 0x16e   : > { %v201_v21 = vsel %vm194_vm2, %v176_v4, %v200_v20 }
 0x16f   : > { %v202_v22 = vsel %vm177_vm1, %v201_v21, 0.0 }
 0x170   : > { %v203_v23 = vrot.slane %v202_v22, 4 }
 0x172   : > { %v204_v24 = vadd.f32 %v203_v23, %v202_v22 }
 0x174   : > { %v205_v25 = vrot.slane %v204_v24, 2 }
 0x176   : > { %v206_v26 = vadd.f32 %v205_v25, %v204_v24 }
 0x178   : > { %v207_v27 = vrot.slane %v206_v26, 1 }
 0x17a   : > { %v208_v28 = vadd.f32 %v207_v27, %v206_v26 }
 0x17c   : > { %209 = vst [vmem:[%s170_s29] sm:$0x1] %v208_v28 }
 0x17d   : > { %447 = shalt.err (!%p444_p9)
}
 0x17e   : > { %s448_s22 = scalar_lea.hbm %s683_s5, 16  ;;  %s452_s26 = scalar_lea.hbm %s728_s2, 64 }
 0x17f   : > { %p449_p1 = scmp.ne.s32.totalorder %s683_s5, %s448_s22  ;;  %p453_p3 = scmp.lt.u32.totalorder %s683_s5, %s728_s2 }
 0x180   : > { %p454_p4 = scmp.lt.u32.totalorder %s452_s26, %s448_s22  ;;  %p456_p10 = scmp.lt.u32.totalorder %s448_s22, %s683_s5 }
 0x181   : > { %p450_p2 = pnand %p449_p1, %p615_p8 }
 0x182   : > { %p455_p6 = por %p454_p4, %p453_p3 }
 0x183   : > { %p451_p7 = pneg %p450_p2 }
 0x184   : > { %p457_p11 = por %p456_p10, %p455_p6 }
 0x186   : > { %p458_p12 = pnand %p457_p11, %p451_p7 }
 0x188   : > { %461 = shalt.err (!%p458_p12)
}
 0x189   : > { %323 = dma.vmem_to_hbm [thread:$0]  (%p615_p8), %s685_s30, 16, %s683_s5, %s211_s6  }
 0x18a PF: > { %p340_p13 = scmp.ge.s32.totalorder %s504_s12, 2  ;;  %s235_s19 = sand.u32 1, %s492_s9  }
 0x18b   : > { %p747_p0 = scmp.ne.s32.totalorder %s733_s16, 0  ;;  %s236_s24 = scalar_lea.sflag [#allocation4], %s235_s19 }
 0x18d   : > { %p334_p5 = pnand %p340_p13, %p747_p0 }
 0x18f   : > { %487 = dma.done.wait (!%p334_p5), %s236_s24, 16  }
 0x190   : > { %489 = vsyncadd (!%p334_p5), %s236_s24, 4294967280  ;;  %p16_p9 = scmp.ge.s32.totalorder %s571_s20, 6   ;;  %s748_s9 = smov %s496_s10 }
 0x191   : > { %s749_s10 = smov %s500_s11  ;;  %s750_s11 = smov %s607_s7 }
 0x192   : > { %s751_s12 = smov %s571_s20  ;;  %18 = sbr.rel (!%p16_p9) target bundleno = 6 (0x6), region = 78 }
 0x199   :  { %240 = vsyncpa [#allocation3], 1 }
 0x19a   :  { %242 = vsyncpa [#allocation3 + $0x1], 1 }
 0x19b   :  { %243 = vsyncpa [#allocation6], 1 }
 0x19c   :  { %245 = vsyncpa [#allocation6 + $0x1], 1 }
 0x19d   :  { %246 = vsyncpa [#allocation4], 1 }
 0x19e   :  { %248 = vsyncpa [#allocation4 + $0x1], 1 }

</bundles_post_ra>
